<compile_context>
chip_gen: v6e
topology: v6e:2x2x1
jax: 0.10.0
libtpu: 0.0.40
codegen_flags: <defaults>
</compile_context>

<pallas_src>
import functools
from math import sqrt

import numpy as np
import jax
import jax.numpy as jnp
from jax import lax
from jax.experimental import pallas as pl
from jax.experimental.pallas import tpu as pltpu


# ----------------------------- sizing helpers --------------------------------

def _vmem_capacity_bytes():
    """Best-effort physical VMEM size; falls back to v7x's per-core 64 MiB."""
    try:
        info = pltpu.get_tpu_info()
        cap = int(getattr(info, "vmem_capacity_bytes", 0))
        if cap > 0:
            return cap
    except Exception:
        pass
    return 64 << 20


def _largest_aligned_divisor(n, cap, align=8):
    """Largest divisor of n that is <= cap and a multiple of `align` (else n)."""
    if n <= cap:
        return n
    for c in range(cap, align - 1, -1):
        if n % c == 0 and c % align == 0:
            return c
    return n


def _pick_tile_q(l, s, d, vmem_cap):
    if l <= 512:
        return l
    budget = max(vmem_cap // 3, 8 << 20)
    for cand in (1024, 512, 256, 128):
        # dominated by the double-buffered bf16 counts (s, tile_q) + k blocks
        if cand <= l and 2 * s * cand * 2 + 2 * s * d * 2 <= budget:
            return cand
    return 128


def _kernel1_vmem_limit(s, d, tile_q, tile_k, vmem_cap):
    est = (2 * tile_q * d * 2        # q block (bf16, double-buffered)
           + 2 * s * d * 2           # k block
           + 2 * s * tile_q * 2      # counts block
           + 4 * tile_q * 4          # output + accumulators
           + 2 * tile_k * tile_q * 4)  # streamed score chunk
    if est <= (12 << 20):
        return None                  # conservative scoped default is plenty
    return int(min(max(2 * est, 32 << 20), max(vmem_cap - (8 << 20), 16 << 20)))


def _pick_head_block(bh, s, l, d, n_top_p, vmem_cap):
    """Heads per kernel-2 grid step (<= 8), capped by a rough VMEM estimate."""
    per_head = (s * d * 10 + l * d * 12 + n_top_p * (4 * s + 6 * l + 6 * d))
    budget = max(vmem_cap // 3, 8 << 20)
    cap = int(max(1, min(8, budget // max(2 * per_head, 1))))
    for hb in range(min(bh, cap), 0, -1):
        if bh % hb == 0:
            return hb
    return 1


# -------------------------------- kernels -------------------------------------

def _sample_scores_kernel(nk_chunks, tile_k, q_ref, k_ref, cnt_ref, m_ref):
    # q_ref: (tile_q, E)  k_ref: (Lk, E)      (bf16 operands, f32 accumulation)
    # cnt_ref: (Lk, tile_q) duplicate-aware sample counts (shared, resident)
    # m_ref: (1, tile_q) f32 lane-dense output row
    lk = k_ref.shape[0]
    tile_q = m_ref.shape[1]
    q = q_ref[...]

    def step(k_blk, cnt_blk, carry):
        m_max, m_sum = carry
        # s^T[j, i] = k_j . q_i  (contract last dims of both operands -> MXU)
        s_t = lax.dot_general(k_blk, q,
                              dimension_numbers=(((1,), (1,)), ((), ())),
                              preferred_element_type=jnp.float32)   # (tile_k, tile_q)
        # duplicate-aware sum (idx_sample is drawn with replacement)
        m_sum = m_sum + jnp.sum(s_t * cnt_blk, axis=0, keepdims=True)
        masked = jnp.where(cnt_blk > 0.0, s_t, -jnp.inf)
        m_max = jnp.maximum(m_max, jnp.max(masked, axis=0, keepdims=True))
        return m_max, m_sum

    init = (jnp.full((1, tile_q), -jnp.inf, jnp.float32),
            jnp.zeros((1, tile_q), jnp.float32))

    if nk_chunks == 1:
        m_max, m_sum = step(k_ref[...], cnt_ref[...].astype(jnp.float32), init)
    else:
        # Stream over Lk so the full (Lk, tile_q) score tile never hits VMEM.
        def body(c, carry):
            start = pl.multiple_of(c * tile_k, tile_k)
            return step(k_ref[pl.ds(start, tile_k), :],
                        cnt_ref[pl.ds(start, tile_k), :].astype(jnp.float32),
                        carry)
        m_max, m_sum = lax.fori_loop(0, nk_chunks, body, init,
                                     unroll=(nk_chunks <= 8))

    m_ref[...] = m_max - m_sum * (1.0 / float(lk))


def _prob_attn_kernel(scale, qr_ref, k_ref, v_ref, idxc_ref, idxr_ref, tri_ref,
                      out_ref):
    # qr_ref: (hb, U, E)  k_ref: (hb, Lk, E)  (bf16)     v_ref: (hb, Lk, E) f32
    # idxc_ref: (hb, U, 1) int32 (-1 marks padded rows)
    # idxr_ref: (hb, 1, U) int32 (same indices, row layout)
    # tri_ref:  (E, E) f32 upper-triangular (resident across the grid)
    # out_ref:  (hb, Lq, E)
    hb, lq, e = out_ref.shape
    n_top_p = qr_ref.shape[1]
    v = v_ref[...]
    mm_dt = qr_ref.dtype

    # initial context = cumsum(v, axis=-1) (mask_flag=True branch) on the MXU.
    # Kept in f32: the cumulative sum is the precision-sensitive matmul.
    tri_b = jnp.broadcast_to(tri_ref[...], (hb, e, e))
    ctx0 = jnp.einsum('hke,hef->hkf', v, tri_b,
                      preferred_element_type=jnp.float32)            # (hb, Lk, E)

    # scores of the selected (top) queries against all keys
    scores = jnp.einsum('hue,hke->huk', qr_ref[...], k_ref[...],
                        preferred_element_type=jnp.float32) * scale  # (hb, U, Lk)

    # ProbMask: mask[h, u, j] = j > index[h, u]  (only for valid rows)
    idx_c = idxc_ref[...]                                            # (hb, U, 1)
    valid = idx_c >= 0
    cols = lax.broadcasted_iota(jnp.int32, scores.shape, 2)
    scores = jnp.where(jnp.logical_and(valid, cols > idx_c), -jnp.inf, scores)

    smax = jnp.max(scores, axis=-1, keepdims=True)
    p = jnp.exp(scores - smax)
    denom = jnp.sum(p, axis=-1, keepdims=True)
    attn = p * pl.reciprocal(denom, approx=True)
    attn = jnp.where(valid, attn, 0.0)           # padded rows contribute nothing

    upd = jnp.einsum('huk,hke->hue', attn.astype(mm_dt), v.astype(mm_dt),
                     preferred_element_type=jnp.float32)             # (hb, U, E)

    # scatter context[index[h, u], :] = upd[h, u, :] as a one-hot matmul +
    # full-tile select (top-k indices are distinct; padded columns never match).
    idx_r = idxr_ref[...]                                            # (hb, 1, U)
    rows = lax.broadcasted_iota(jnp.int32, (hb, lq, n_top_p), 1)
    hit = rows == idx_r                                              # (hb, Lq, U)
    sel = hit.astype(mm_dt)
    scat = jnp.einsum('hlu,hue->hle', sel, upd.astype(mm_dt),
                      preferred_element_type=jnp.float32)            # (hb, Lq, E)
    row_hit = jnp.sum(hit.astype(jnp.float32), axis=-1, keepdims=True) > 0.0
    out_ref[...] = jnp.where(row_hit, scat, ctx0).astype(out_ref.dtype)


# -------------------------------- wrapper --------------------------------------

def prob_attention_pallas(queries, keys, values, attn_mask=None, *,
                          factor=5, scale=None, mask_flag=True,
                          idx_sample=None, sample_rng=None,
                          use_bf16_matmul=True, out_dtype=None,
                          return_aux=False):
    """Forward pass of ProbAttention (default config: mask_flag=True, scale=None)."""
    assert mask_flag, "only the default mask_flag=True branch is implemented"
    # TODO(synk): mask_flag=False branch (mean-context init) and an externally
    # supplied attn_mask are not implemented; the default forward builds ProbMask.
    assert attn_mask is None

    b, l, h, d = queries.shape
    _, s, _, _ = keys.shape
    assert l == s, "mask_flag=True requires L_q == L_v (as asserted in torch code)"

    vmem_cap = _vmem_capacity_bytes()
    mm_dtype = jnp.bfloat16 if use_bf16_matmul else queries.dtype

    # torch .view(b, h, l, -1) on a contiguous (b, l, h, d) tensor == reshape.
    # q/k in bf16 for MXU rate + halved DMA; v stays f32 (cumsum precision).
    q2 = jnp.reshape(queries, (b, h, l, d)).reshape(b * h, l, d).astype(mm_dtype)
    k2 = jnp.reshape(keys, (b, h, s, d)).reshape(b * h, s, d).astype(mm_dtype)
    v2 = jnp.reshape(values, (b, h, s, d)).reshape(b * h, s, d).astype(jnp.float32)
    bh = b * h

    n_top = int(factor * np.ceil(np.log(s)))     # U (number of selected queries)
    samp_k = int(factor * np.ceil(np.log(l)))    # u (number of sampled keys)
    assert n_top <= l and samp_k <= s, "factor too large for these sequence lengths"

    if idx_sample is None:
        if sample_rng is None:
            sample_rng = jax.random.PRNGKey(42)
        idx_sample = jax.random.randint(sample_rng, (l, samp_k), 0, s, dtype=jnp.int32)
    idx_sample = idx_sample.astype(jnp.int32)

    # Duplicate-aware multi-hot count mask (scatter-add, O(l*samp_k)), shared
    # across all heads, transposed so the per-query reduction runs along
    # sublanes and kernel-1's output is lane-dense.  Exact small ints -> bf16.
    row_ids = jnp.broadcast_to(jnp.arange(l, dtype=jnp.int32)[:, None],
                               idx_sample.shape)
    counts_t = (jnp.zeros((s, l), jnp.float32)
                .at[idx_sample, row_ids].add(1.0)
                .astype(mm_dtype))                                   # (s, l)

    # ---- kernel 1: sparsity measure M -------------------------------------
    tile_q = _pick_tile_q(l, s, d, vmem_cap)
    n_qt = pl.cdiv(l, tile_q)
    tile_k = _largest_aligned_divisor(s, 512)      # Lk streaming chunk
    nk_chunks = s // tile_k

    cp_kwargs = dict(dimension_semantics=("parallel", "parallel"))
    vlim = _kernel1_vmem_limit(s, d, tile_q, tile_k, vmem_cap)
    if vlim is not None:
        cp_kwargs["vmem_limit_bytes"] = vlim

    k1 = functools.partial(_sample_scores_kernel, nk_chunks, tile_k)
    m = pl.pallas_call(
        k1,
        out_shape=jax.ShapeDtypeStruct((bh, 1, l), jnp.float32),
        grid=(n_qt, bh),         # bh innermost -> shared counts block stays resident
        in_specs=[
            pl.BlockSpec((None, tile_q, d), lambda qt, i: (i, qt, 0)),
            pl.BlockSpec((None, s, d), lambda qt, i: (i, 0, 0)),
            pl.BlockSpec((s, tile_q), lambda qt, i: (0, qt)),   # independent of i
        ],
        out_specs=pl.BlockSpec((None, 1, tile_q), lambda qt, i: (i, 0, qt)),
        compiler_params=pltpu.CompilerParams(**cp_kwargs),
    )(q2, k2, counts_t)
    m = m[:, 0, :]                                                   # (bh, l)

    # top-k query selection (glue) + sublane-aligned padding of the row count
    _, m_top = lax.top_k(m, n_top)                                   # (bh, n_top)
    m_top = m_top.astype(jnp.int32)
    n_top_p = max(8, int(np.ceil(n_top / 8)) * 8)
    m_top_p = jnp.pad(m_top, ((0, 0), (0, n_top_p - n_top)), constant_values=-1)
    gather_idx = jnp.where(m_top_p < 0, 0, m_top_p)
    q_reduce = jnp.take_along_axis(q2, gather_idx[:, :, None], axis=1)  # (bh, U_p, d)
    idx_col = m_top_p[:, :, None]                                     # (bh, U_p, 1)
    idx_row = m_top_p[:, None, :]                                     # (bh, 1, U_p)

    scale_v = float(scale) if scale is not None else 1.0 / sqrt(d)

    # upper-triangular selector for the feature-dim cumsum (built once, resident)
    rr = jnp.arange(d, dtype=jnp.int32)
    tri = (rr[:, None] <= rr[None, :]).astype(jnp.float32)            # (d, d)

    # ---- kernel 2: masked softmax attention + context update --------------
    # TODO(synk): tile kernel 2 over Lq (k/v resident) for very long sequences
    # on v7x's 64 MiB VMEM; current shapes fit with head-batching alone.
    hb = _pick_head_block(bh, s, l, d, n_top_p, vmem_cap)
    out_dt = queries.dtype if out_dtype is None else out_dtype

    kernel2 = functools.partial(_prob_attn_kernel, scale_v)
    context = pl.pallas_call(
        kernel2,
        out_shape=jax.ShapeDtypeStruct((bh, l, d), out_dt),
        grid=(bh // hb,),
        in_specs=[
            pl.BlockSpec((hb, n_top_p, d), lambda i: (i, 0, 0)),
            pl.BlockSpec((hb, s, d), lambda i: (i, 0, 0)),
            pl.BlockSpec((hb, s, d), lambda i: (i, 0, 0)),
            pl.BlockSpec((hb, n_top_p, 1), lambda i: (i, 0, 0)),
            pl.BlockSpec((hb, 1, n_top_p), lambda i: (i, 0, 0)),
            pl.BlockSpec((d, d), lambda i: (0, 0)),
        ],
        out_specs=pl.BlockSpec((hb, l, d), lambda i: (i, 0, 0)),
        compiler_params=pltpu.CompilerParams(dimension_semantics=("parallel",)),
    )(q_reduce, k2, v2, idx_col, idx_row, tri)

    context = context.reshape(b, h, l, d)
    if return_aux:
        return context, m, m_top
    return context


if __name__ == "__main__":
    B, L, H, D = 2, 16, 2, 16          # seq length chosen so factor*ceil(log(L)) <= L
    factor = 5

    key = jax.random.PRNGKey(0)
    kq, kk, kv, ks = jax.random.split(key, 4)
    queries = jax.random.normal(kq, (B, L, H, D), jnp.float32)
    keys = jax.random.normal(kk, (B, L, H, D), jnp.float32)
    values = jax.random.normal(kv, (B, L, H, D), jnp.float32)

    samp_k = int(factor * np.ceil(np.log(L)))
    idx_sample = jax.random.randint(ks, (L, samp_k), 0, L, dtype=jnp.int32)

    ctx, m, m_top = prob_attention_pallas(
        queries, keys, values, None, factor=factor,
        idx_sample=idx_sample, return_aux=True)
    ctx = jax.block_until_ready(ctx)

    # ---------------- pure-JAX reference check -----------------------------
    # Reference uses the same bf16-rounded q/k the kernels consume (v stays f32),
    # so the check isolates kernel correctness from the wrapper's dtype choice.
    bh = B * H
    q2 = queries.reshape(B, H, L, D).reshape(bh, L, D)
    k2 = keys.reshape(B, H, L, D).reshape(bh, L, D)
    v2 = values.reshape(B, H, L, D).reshape(bh, L, D)
    q2b = q2.astype(jnp.bfloat16).astype(jnp.float32)
    k2b = k2.astype(jnp.bfloat16).astype(jnp.float32)
    scale = 1.0 / sqrt(D)
    hi = jax.lax.Precision.HIGHEST

    # reference sparsity measure
    k_sample = k2b[:, idx_sample, :]                                  # (BH, L, u, D)
    qk_sample = jnp.einsum('ble,blue->blu', q2b, k_sample, precision=hi)
    ref_m = jnp.max(qk_sample, -1) - jnp.sum(qk_sample, -1) / L
    np.testing.assert_allclose(np.asarray(m), np.asarray(ref_m), rtol=2e-2, atol=2e-2)

    # reference context using the same selected indices
    q_red = jnp.take_along_axis(q2b, m_top[:, :, None], axis=1)
    scores = jnp.einsum('bue,ble->bul', q_red, k2b, precision=hi) * scale
    mask = jnp.arange(L)[None, None, :] > m_top[:, :, None]
    scores = jnp.where(mask, -jnp.inf, scores)
    attn = jax.nn.softmax(scores, axis=-1)
    ref_ctx = jnp.cumsum(v2, axis=-1)
    upd = jnp.einsum('bul,ble->bue', attn, v2, precision=hi)
    ref_ctx = ref_ctx.at[jnp.arange(bh)[:, None], m_top].set(upd)
    ref_ctx = ref_ctx.reshape(B, H, L, D)
    np.testing.assert_allclose(np.asarray(ctx), np.asarray(ref_ctx), rtol=2e-2, atol=2e-2)

    print("KERNEL_OK")
</pallas_src>

<mosaic_0001>
module attributes {stable_mosaic.version = 11 : i64} {
  func.func @_sample_scores_kernel(%arg0: i32, %arg1: i32, %arg2: memref<1x16x16xbf16, #tpu.memory_space<vmem>>, %arg3: memref<1x16x16xbf16, #tpu.memory_space<vmem>>, %arg4: memref<16x16xbf16, #tpu.memory_space<vmem>>, %arg5: memref<1x1x16xf32, #tpu.memory_space<vmem>>) attributes {dimension_semantics = [#tpu.dimension_semantics<parallel>, #tpu.dimension_semantics<parallel>], iteration_bounds = array<i64: 1, 4>, scalar_prefetch = 0 : i64, scratch_operands = 0 : i64, tpu.core_type = #tpu.core_type<tc>, window_params = [{transform_indices = @transform_0, window_bounds = array<i64: 1, 16, 16>}, {transform_indices = @transform_1, window_bounds = array<i64: 1, 16, 16>}, {transform_indices = @transform_2, window_bounds = array<i64: 16, 16>}, {transform_indices = @transform_3, window_bounds = array<i64: 1, 1, 16>}]} {
    %c0 = arith.constant 0 : index
    %c0_0 = arith.constant 0 : index
    %c0_1 = arith.constant 0 : index
    %0 = vector.load %arg2[%c0, %c0_0, %c0_1] : memref<1x16x16xbf16, #tpu.memory_space<vmem>>, vector<1x16x16xbf16>
    %1 = vector.shape_cast %0 : vector<1x16x16xbf16> to vector<16x16xbf16>
    %cst = arith.constant 0xFF800000 : f32
    %2 = vector.broadcast %cst : f32 to vector<1x16xf32>
    %cst_2 = arith.constant 0.000000e+00 : f32
    %3 = vector.broadcast %cst_2 : f32 to vector<1x16xf32>
    %c0_3 = arith.constant 0 : index
    %c0_4 = arith.constant 0 : index
    %c0_5 = arith.constant 0 : index
    %4 = vector.load %arg3[%c0_3, %c0_4, %c0_5] : memref<1x16x16xbf16, #tpu.memory_space<vmem>>, vector<1x16x16xbf16>
    %5 = vector.shape_cast %4 : vector<1x16x16xbf16> to vector<16x16xbf16>
    %c0_6 = arith.constant 0 : index
    %c0_7 = arith.constant 0 : index
    %6 = vector.load %arg4[%c0_6, %c0_7] : memref<16x16xbf16, #tpu.memory_space<vmem>>, vector<16x16xbf16>
    %7 = arith.extf %6 : vector<16x16xbf16> to vector<16x16xf32>
    %cst_8 = arith.constant dense<0.000000e+00> : vector<16x16xf32>
    %8 = tpu.matmul %5, %1, %cst_8 {dimension_numbers = #tpu.dot_dimension_numbers<[1], [1], [0], [0], [0, 0, 1, 0], [], []>} : vector<16x16xbf16>, vector<16x16xbf16>, vector<16x16xf32> -> vector<16x16xf32>
    %9 = arith.mulf %8, %7 : vector<16x16xf32>
    %cst_9 = arith.constant dense<0.000000e+00> : vector<16xf32>
    %10 = vector.multi_reduction <add>, %9, %cst_9 [0] : vector<16x16xf32> to vector<16xf32>
    %11 = vector.shape_cast %10 : vector<16xf32> to vector<1x16xf32>
    %12 = arith.addf %3, %11 : vector<1x16xf32>
    %cst_10 = arith.constant 0.000000e+00 : f32
    %13 = vector.broadcast %cst_10 : f32 to vector<16x16xf32>
    %14 = arith.cmpf ogt, %7, %13 : vector<16x16xf32>
    %cst_11 = arith.constant 0xFF800000 : f32
    %15 = vector.broadcast %cst_11 : f32 to vector<16x16xf32>
    %16 = arith.select %14, %8, %15 : vector<16x16xi1>, vector<16x16xf32>
    %cst_12 = arith.constant dense<0xFF800000> : vector<16xf32>
    %17 = vector.multi_reduction <maximumf>, %16, %cst_12 [0] : vector<16x16xf32> to vector<16xf32>
    %18 = vector.shape_cast %17 : vector<16xf32> to vector<1x16xf32>
    %19 = arith.maximumf %2, %18 : vector<1x16xf32>
    %cst_13 = arith.constant 6.250000e-02 : f32
    %20 = vector.broadcast %cst_13 : f32 to vector<1x16xf32>
    %21 = arith.mulf %12, %20 : vector<1x16xf32>
    %22 = arith.subf %19, %21 : vector<1x16xf32>
    %c0_14 = arith.constant 0 : index
    %c0_15 = arith.constant 0 : index
    %c0_16 = arith.constant 0 : index
    %23 = vector.load %arg5[%c0_14, %c0_15, %c0_16] : memref<1x1x16xf32, #tpu.memory_space<vmem>>, vector<1x1x16xf32>
    %24 = vector.shape_cast %23 : vector<1x1x16xf32> to vector<1x16xf32>
    %25 = vector.shape_cast %22 : vector<1x16xf32> to vector<1x1x16xf32>
    tpu.vector_store %arg5[%c0_14, %c0_15, %c0_16], %25 {strides = array<i32>} : memref<1x1x16xf32, #tpu.memory_space<vmem>>, vector<1x1x16xf32>,
    return
  }
  func.func @transform_0(%arg0: i32, %arg1: i32) -> (i32, i32, i32) {
    %c0_i32 = arith.constant 0 : i32
    %c0_i32_0 = arith.constant 0 : i32
    return %arg1, %arg0, %c0_i32 : i32, i32, i32
  }
  func.func @transform_1(%arg0: i32, %arg1: i32) -> (i32, i32, i32) {
    %c0_i32 = arith.constant 0 : i32
    %c0_i32_0 = arith.constant 0 : i32
    %c0_i32_1 = arith.constant 0 : i32
    return %arg1, %c0_i32, %c0_i32_0 : i32, i32, i32
  }
  func.func @transform_2(%arg0: i32, %arg1: i32) -> (i32, i32) {
    %c0_i32 = arith.constant 0 : i32
    %c0_i32_0 = arith.constant 0 : i32
    return %c0_i32, %arg0 : i32, i32
  }
  func.func @transform_3(%arg0: i32, %arg1: i32) -> (i32, i32, i32) {
    %c0_i32 = arith.constant 0 : i32
    %c0_i32_0 = arith.constant 0 : i32
    return %arg1, %c0_i32, %arg0 : i32, i32, i32
  }
}

</mosaic_0001>

<bundles_post_ra>
// kernel: tpu_custom_call.1
= control target key start
LH: loop header
LB: loop body
LE: loop exit
PB: predicated region body
PF: predicated region fallthrough
CT: control target
= control target key end

     0   :  { %s1006_s0 = inlined_call_operand.hbm [shape: bf16[4,16,16], index: 0, kind: input, shape index: {}]   ;;  %s1007_s1 = inlined_call_operand.hbm [shape: bf16[4,16,16], index: 1, kind: input, shape index: {}]   ;;  %s1008_s2 = inlined_call_operand.hbm [shape: bf16[16,16], index: 2, kind: input, shape index: {}]   ;;  %s1009_s3 = inlined_call_operand.hbm [shape: f32[4,1,16], index: 3, kind: output, shape index: {}]  }
   0x1   :  { %1016 = sst [smem:[#allocation14_spill]] %s1008_s2 }
   0x2   :  { %8 = vsyncpa [#allocation3], 0 }
   0x3   :  { %10 = vsyncpa [#allocation3 + $0x1], 0 }
   0x4   :  { %11 = vsyncpa [#allocation6], 0 }
   0x5   :  { %13 = vsyncpa [#allocation6 + $0x1], 0 }
   0x6   :  { %14 = vsyncpa [#allocation4], 0 }
   0x7   :  { %16 = vsyncpa [#allocation4 + $0x1], 0  ;;  %s809_s12 = smov 0   ;;  %s811_s13 = smov 0  }
   0x8   :  { %s813_s14 = smov 0   ;;  %s815_s15 = smov 0  }
   0x9   :  { %s817_s16 = smov 0   ;;  %s819_s17 = smov 0  }
   0xa LB: > { %s840_s18 = sadd.s32 4294967295, %s779_s17   ;;  %s491_s19 = sadd.s32 4294967294, %s779_s17   ;;  %s779_s17 = sphi %s819_s17, %s22_s17   ;;  %s775_s16 = sphi %s817_s16, %s1036_s16   ;;  %s771_s15 = sphi %s815_s15, %s1035_s15   ;;  %s767_s14 = sphi %s813_s14, %s1034_s14   ;;  %s763_s13 = sphi %s811_s13, %s1033_s13   ;;  %s759_s12 = sphi %s809_s12, %s1032_s12  }
   0xb   : > { %p56_p0 = scmp.ne.s32.totalorder %s763_s13, %s759_s12  ;;  %p1015_p1 = scmp.eq.s32.totalorder %s840_s18, 0 }
   0xc   : > { %p140_p3 = scmp.eq.s32.totalorder %s491_s19, 3  ;;  %p492_p5 = scmp.ge.s32.totalorder %s779_s17, 1 }
   0xd   : > { %p849_p4 = por %p1015_p1, %p56_p0  ;;  %p147_p7 = scmp.lt.s32.totalorder %s779_s17, 5 }
   0xe   : > { %p854_p6 = por %p140_p3, %p56_p0  ;;  %s781_s23 = smov [#allocation7]  }
   0xf   : > { %p859_p8 = pnand %p492_p5, %p147_p7  ;;  %s161_s24 = sshll.u32 %s781_s23, 4  ;;  %s162_s24 = int_to_ptr.vmem [resolvable:$true] %s161_s24 }
  0x10   : > { %s31_s26 = sadd.s32 1, %s775_s16  ;;  %s620_s27 = scalar_lea.vmem %s162_s24, 128 }
  0x11   : > { %p535_p9 = pneg %p859_p8  ;;  %p621_p12 = scmp.ne.s32.totalorder %s162_s24, %s620_s27 }
  0x12   : > { %p628_p3 = scmp.lt.s32.totalorder %s162_s24, %s162_s24  ;;  %p629_p5 = scmp.lt.s32.totalorder %s620_s27, %s620_s27 }
  0x13   : > { %p867_p10 = pnand %p535_p9, %p1015_p1 }
  0x14   : > { %p630_p7 = por %p629_p5, %p628_p3 }
  0x15   : > { %p611_p11 = pneg %p867_p10 }
  0x17   : > { %p623_p13 = pnand %p621_p12, %p611_p11 }
  0x19   : > { %p624_p0 = pneg %p623_p13 }
  0x1b   : > { %p631_p2 = pnand %p630_p7, %p624_p0 }
  0x1d   : > { %634 = shalt.err (!%p631_p2)
}
  0x1e   : > { %s1010_s28 = smov 64   ;;  %s1012_s29 = smov 4  }
  0x1f   : > { %s1021_s2 = sld [smem:[#allocation14_spill]]  ;;  %p32_p2 = scmp.ge.s32.totalorder %s31_s26, 4 }
  0x20   : > { %s43_s5 = sadd.s32 1, %s767_s14  ;;  %p50_p9 = scmp.ne.s32.totalorder %s767_s14, %s763_s13 }
  0x21   : > { %p51_p11 = scmp.eq.s32.totalorder %s779_s17, 0  ;;  %s1038_s26 = smov (%p32_p2, %s31_s26), 0 }
  0x22   : > { %1022 = sst [smem:[#allocation13_spill]] %s1038_s26  ;;  %p1024_p13 = scmp.eq.s32.totalorder %s840_s18, 3 }
  0x23   : > { %p888_p12 = por %p51_p11, %p50_p9  ;;  %s38_s8 = ssub.s32 %s775_s16, %s1038_s26 }
  0x24   : > { %p894_p0 = por %p1024_p13, %p50_p9  ;;  %p551_p3 = scmp.lt.s32.totalorder %s779_s17, 4 }
  0x25   : > { %538 = dma.hbm_to_vmem [thread:$0]  (!%p867_p10), %s1021_s2, 128, %s162_s24, [#allocation6], %s1010_s28, %s1010_s28, %s1012_s29  }
  0x26   : > { %p41_p10 = scmp.eq.s32.totalorder %s38_s8, 0  ;;  %s175_s9 = sand.u32 1, %s767_s14  }
  0x27   : > { %s495_s10 = sshll.u32 %s175_s9, 3  ;;  %s511_s19 = sshll.u32 %s775_s16, 7 }
  0x28   : > { %s903_s11 = scalar_select %p41_p10, %s767_s14, %s43_s5  }
  0x29   : > { %s187_s25 = scalar_lea.hbm %s1006_s0, %s511_s19  ;;  %s179_s27 = scalar_lea.vmem [#allocation2], %s495_s10 }
  0x2a   : > { %s188_s30 = sshll.u32 %s179_s27, 4  ;;  %p911_p5 = pnand %p551_p3, %p888_p12  ;;  %s189_s30 = int_to_ptr.vmem [resolvable:$true] %s188_s30 }
  0x2b   : > { %s918_s5 = scalar_lea.hbm %s1007_s1, %s511_s19  ;;  %s202_s8 = scalar_lea.vmem [#allocation5], %s495_s10 }
  0x2c   : > { %s209_s2 = sshll.u32 %s202_s8, 4  ;;  %s176_s26 = scalar_lea.sflag [#allocation3], %s175_s9  ;;  %s210_s2 = int_to_ptr.vmem [resolvable:$true] %s209_s2 }
  0x2d   : > { %p637_p7 = pneg %p911_p5  ;;  %s648_s23 = scalar_lea.vmem %s189_s30, 128 }
  0x2e   : > { %p649_p2 = scmp.ne.s32.totalorder %s189_s30, %s648_s23  ;;  %s784_s6 = smov [#allocation2]  }
  0x2f   : > { %s653_s24 = sshll.u32 %s784_s6, 4  ;;  %s654_s24 = int_to_ptr.vmem [resolvable:$false] %s653_s24 }
  0x30   : > { %p651_p9 = pnand %p649_p2, %p637_p7  ;;  %s655_s27 = scalar_lea.vmem %s654_s24, 256 }
  0x31   : > { %p656_p12 = scmp.lt.s32.totalorder %s189_s30, %s654_s24  ;;  %p657_p13 = scmp.lt.s32.totalorder %s655_s27, %s648_s23 }
  0x32   : > { %p652_p11 = pneg %p651_p9 }
  0x33   : > { %p658_p3 = por %p657_p13, %p656_p12 }
  0x35   : > { %p659_p10 = pnand %p658_p3, %p652_p11 }
  0x37   : > { %662 = shalt.err (!%p659_p10)
}
  0x38   : > { %s1027_s28 = smov 4   ;;  %s1028_s29 = smov 64  }
  0x39   : > { %542 = dma.hbm_to_vmem [thread:$0]  (!%p911_p5), %s187_s25, 128, %s189_s30, %s176_s26, %s1028_s29, %s1028_s29, %s1027_s28  }
  0x3a   : > { %s198_s9 = sand.u32 1, %s779_s17   ;;  %s676_s19 = scalar_lea.vmem %s210_s2, 128 }
  0x3b   : > { %s199_s10 = scalar_lea.sflag [#allocation6], %s198_s9  ;;  %p677_p2 = scmp.ne.s32.totalorder %s210_s2, %s676_s19 }
  0x3c   : > { %s785_s8 = smov [#allocation5]  }
  0x3d   : > { %p679_p9 = pnand %p677_p2, %p637_p7  ;;  %s681_s23 = sshll.u32 %s785_s8, 4  ;;  %s682_s23 = int_to_ptr.vmem [resolvable:$false] %s681_s23 }
  0x3e   : > { %s683_s6 = scalar_lea.vmem %s682_s23, 256  ;;  %p684_p11 = scmp.lt.s32.totalorder %s210_s2, %s682_s23 }
  0x3f   : > { %p680_p1 = pneg %p679_p9  ;;  %p685_p12 = scmp.lt.s32.totalorder %s683_s6, %s676_s19 }
  0x41   : > { %p686_p13 = por %p685_p12, %p684_p11 }
  0x43   : > { %p687_p3 = pnand %p686_p13, %p680_p1 }
  0x45   : > { %690 = shalt.err (!%p687_p3)
}
  0x46   : > { %545 = dma.hbm_to_vmem [thread:$0]  (!%p911_p5), %s918_s5, 128, %s210_s2, %s199_s10, %s1028_s29, %s1028_s29, %s1027_s28  }
  0x47   : > { %221 = sbr.rel (%p859_p8) target bundleno = 323 (0x143), region = 32  ;;  %s943_s26 = sand.u32 (!%p859_p8), 1, %s763_s13  }
  0x48   : > { %s502_s25 = sshll.u32 (!%p859_p8), %s943_s26, 3  ;;  %s224_s30 = scalar_lea.sflag (!%p859_p8), [#allocation3], %s943_s26 }
  0x49   : > { %s227_s24 = scalar_lea.vmem (!%p859_p8), [#allocation2], %s502_s25 }
  0x4c   : > { %742 = dma.done.wait (%p849_p4), %s224_s30, 128  }
  0x4d   : > { %744 = vsyncadd (%p849_p4), %s224_s30, 4294967168  ;;  %s232_s2 = sand.u32 1, %s840_s18   ;;  %s236_s22 = scalar_lea.vmem [#allocation5], %s502_s25 }
  0x4e   : > { %s233_s4 = scalar_lea.sflag [#allocation6], %s232_s2 }
  0x4f   : > { %746 = dma.done.wait (%p849_p4), %s233_s4, 128  }
  0x50   : > { %748 = vsyncadd (%p849_p4), %s233_s4, 4294967168  ;;  %p1029_p1 = scmp.eq.s32.totalorder %s840_s18, 0 }
  0x52   : > { %750 = dma.done.wait (%p1029_p1), [#allocation6], 128   ;;  %p1030_p8 = pmov %p1029_p1 }
  0x53   : > { %v786_v0 = vmov 0.0   ;;  %vm787_vm0 = vmmov 0   ;;  %vm287_vm1 = vcmask 130048   ;;  %v607_v1 = vld [vmem:[%s227_s24] sm:$0xff]   ;;  %v608_v3 = vld [vmem:[%s236_s22] sm:$0xff]   ;;  %s508_s18 = sshll.u32 %s771_s15, 4 }
  0x54   : > { %752 = vsyncadd (%p1030_p8), [#allocation6], 4294967168  ;;  %519 = vmatprep.subr.bf16.mxu0 %v786_v0  ;;  %521 = vmatprep.mubr.msk.bf16.mxu0 %vm787_vm0, %v786_v0  ;;  %v292_v2 = vsel %vm287_vm1, %v607_v1, 0  ;;  %v514_v4 = vld [vmem:[#allocation7] sm:$0xff]   ;;  %s266_s20 = scalar_lea.vmem [#allocation8], %s943_s26  ;;  %vm362_vm4 = vcmask 122880   ;;  %s376_s29 = scalar_lea.hbm %s1009_s3, %s508_s18 }
  0x55   : > { %520 = vmatpush3.bf16.xpose.msra.mxu0 %v292_v2  ;;  %v515_v5 = vunpack.c.l.bf16 %v514_v4  ;;  %v516_v6 = vunpack.c.h.bf16 %v514_v4  ;;  %s378_s5 = sshll.u32 %s266_s20, 4  ;;  %s365_s9 = scalar_lea.sflag [#allocation4], %s943_s26  ;;  %s379_s5 = int_to_ptr.vmem [resolvable:$true] %s378_s5 }
  0x56   : > { %s691_s10 = scalar_lea.vmem %s379_s5, 16  ;;  %s788_s19 = smov [#allocation8]  }
  0x57   : > { %vm347_vm2 = vcmp.gt.f32.partialorder %v515_v5, 0.0  ;;  %vm348_vm3 = vcmp.gt.f32.partialorder %v516_v6, 0.0  ;;  %p692_p4 = scmp.ne.s32.totalorder %s379_s5, %s691_s10  ;;  %s695_s15 = sshll.u32 %s788_s19, 4  ;;  %s696_s15 = int_to_ptr.vmem [resolvable:$false] %s695_s15 }
  0x58   : > { %s697_s8 = scalar_lea.vmem %s696_s15, 32  ;;  %p698_p10 = scmp.lt.s32.totalorder %s379_s5, %s696_s15 }
  0x59   : > { %p693_p5 = pnand %p692_p4, %p894_p0  ;;  %p699_p2 = scmp.lt.s32.totalorder %s697_s8, %s691_s10 }
  0x5b   : > { %p694_p7 = pneg %p693_p5  ;;  %p700_p9 = por %p699_p2, %p698_p10 }
  0x5c   : > { %522 = vmatmul.mubr.msk.bf16.vlgmr.msra.gmra.mxu0 %vm287_vm1, %v608_v3 }
  0x5d   : > { %p701_p11 = pnand %p700_p9, %p694_p7 }
 0x11c   : > { %v328_v7 = vpop.f32.mrf.mxu0 }
 0x11d   : > { %v335_v9 = vmul.f32 %v515_v5, %v328_v7  ;;  %v349_v10 = vsel %vm347_vm2, %v328_v7, -inf }
 0x11e   : > { %v523_v8 = vpop.f32.mrf.mxu0  ;;  %v351_v14 = vsel %vm287_vm1, %v349_v10, -inf }
 0x11f   : > { %v337_v17 = vsel %vm287_vm1, %v335_v9, 0.0 }
 0x120   : > { %v331_v11 = vpop.f32.mrf.mxu0 }
 0x121   : > { %v336_v12 = vmul.f32 %v516_v6, %v331_v11  ;;  %v350_v13 = vsel %vm348_vm3, %v331_v11, -inf }
 0x122   : > { %v352_v15 = vsel %vm287_vm1, %v350_v13, -inf  ;;  %v524_v16 = vpop.f32.mrf.mxu0 }
 0x123   : > { %v338_v18 = vsel %vm287_vm1, %v336_v12, 0.0  ;;  %v353_v19 = vmax.f32 %v351_v14, %v352_v15 }
 0x124   : > { %v339_v20 = vadd.f32 %v338_v18, %v337_v17 }
 0x125   : > { %v354_v21 = vrot.slane %v353_v19, 4 }
 0x126   : > { %v340_v22 = vrot.slane %v339_v20, 4 }
 0x127   : > { %v355_v23 = vmax.f32 %v353_v19, %v354_v21 }
 0x128   : > { %v341_v24 = vadd.f32 %v340_v22, %v339_v20 }
 0x129   : > { %v356_v25 = vrot.slane %v355_v23, 2 }
 0x12a   : > { %v342_v26 = vrot.slane %v341_v24, 2 }
 0x12b   : > { %v357_v27 = vmax.f32 %v355_v23, %v356_v25 }
 0x12c   : > { %v343_v28 = vadd.f32 %v342_v26, %v341_v24 }
 0x12d   : > { %v358_v30 = vrot.slane %v357_v27, 1 }
 0x12e   : > { %v344_v29 = vrot.slane %v343_v28, 1 }
 0x12f   : > { %v359_v32 = vmax.f32 %v357_v27, %v358_v30 }
 0x130   : > { %v345_v31 = vadd.f32 %v344_v29, %v343_v28 }
 0x132   : > { %v360_v33 = vmul.f32 0.0625, %v345_v31 }
 0x134   : > { %v361_v34 = vsub.f32 %v359_v32, %v360_v33 }
 0x136   : > { %363 = vst.msk [vmem:[%s266_s20] sm:$0x1] %vm362_vm4, %v361_v34 }
 0x137   : > { %704 = shalt.err (!%p701_p11)
}
 0x138   : > { %s705_s23 = scalar_lea.hbm %s376_s29, 16  ;;  %s709_s25 = scalar_lea.hbm %s1009_s3, 64 }
 0x139   : > { %p706_p12 = scmp.ne.s32.totalorder %s376_s29, %s705_s23  ;;  %p710_p1 = scmp.lt.s32.totalorder %s376_s29, %s1009_s3 }
 0x13a   : > { %p711_p8 = scmp.lt.s32.totalorder %s709_s25, %s705_s23 }
 0x13b   : > { %p707_p13 = pnand %p706_p12, %p894_p0 }
 0x13c   : > { %p712_p4 = por %p711_p8, %p710_p1 }
 0x13d   : > { %p708_p3 = pneg %p707_p13 }
 0x13f   : > { %p713_p5 = pnand %p712_p4, %p708_p3 }
 0x141   : > { %716 = shalt.err (!%p713_p5)
}
 0x142   : > { %533 = dma.vmem_to_hbm [thread:$0]  (%p894_p0), %s379_s5, 16, %s376_s29, %s365_s9  }
 0x143 PF: > { %p553_p7 = scmp.ge.s32.totalorder %s779_s17, 2  ;;  %s390_s2 = sand.u32 1, %s759_s12  }
 0x144   : > { %s391_s4 = scalar_lea.sflag [#allocation4], %s390_s2 }
 0x145   : > { %p547_p10 = pnand %p553_p7, %p854_p6 }
 0x147   : > { %p548_p2 = pneg %p547_p10 }
 0x149   : > { %754 = dma.done.wait (%p548_p2), %s391_s4, 16  }
 0x14a   : > { %756 = vsyncadd (%p548_p2), %s391_s4, 4294967280  ;;  %s22_s17 = sadd.s32 1, %s779_s17   ;;  %s1031_s7 = sld [smem:[#allocation13_spill]] }
 0x14b   : > { %p19_p9 = scmp.ge.s32.totalorder %s22_s17, 6   ;;  %s1032_s12 = smov %s763_s13 }
 0x14c   : > { %s1033_s13 = smov %s767_s14  ;;  %s1034_s14 = smov %s903_s11 }
 0x14d   : > { %s1035_s15 = smov %s775_s16  ;;  %21 = sbr.rel (!%p19_p9) target bundleno = 10 (0xa), region = 95 }
 0x150   : > { %s1036_s16 = smov %s1031_s7 }
 0x152   :  { %395 = vsyncpa [#allocation3], 1 }
 0x153   :  { %397 = vsyncpa [#allocation3 + $0x1], 1 }
 0x154   :  { %398 = vsyncpa [#allocation6], 1 }
 0x155   :  { %400 = vsyncpa [#allocation6 + $0x1], 1 }
 0x156   :  { %401 = vsyncpa [#allocation4], 1 }
 0x157   :  { %403 = vsyncpa [#allocation4 + $0x1], 1 }

</bundles_post_ra>
